<compile_context>
chip_gen: v7x
topology: tpu7x:2x2x1
jax: 0.10.0
libtpu: 0.0.40
codegen_flags: <defaults>
</compile_context>

<pallas_src>
import jax
import jax.numpy as jnp
from jax import lax
from jax.experimental import pallas as pl
from jax.experimental.pallas import tpu as pltpu


def _relu6(x):
    return jnp.minimum(jnp.maximum(x, 0.0), 6.0)


# ----------------------------------------------------------------------------
# Kernel
# ----------------------------------------------------------------------------

def _make_kernel(H, W, bn, c_in, c_mid, c_out):
    """Per-grid-step kernel; H, W, bn and channel counts are static ints."""
    L = bn * H * W
    # Flattened-lane offset of each of the 9 depthwise taps.
    shifts = [(ky - 1) * W + (kx - 1) for ky in range(3) for kx in range(3)]

    def kernel(x_ref, w1_ref, dwp_ref, w3_ref, bias_ref, o_ref):
        # x_ref   : (c_in+1, L)   input slab, spatial*batch on lanes, last row = ones
        # w1_ref  : (c_mid, c_in+1) 1x1 expand weight with folded-BN bias column
        # dwp_ref : (9, c_mid, L) masked depthwise weight planes (BN scale folded)
        # w3_ref  : (c_out, c_mid) 1x1 project weight (BN scale folded)
        # bias_ref: (c_mid+c_out, 1) packed [b2; b3] folded-BN biases
        # o_ref   : (c_out, L)
        xa = x_ref[...]                                          # (c_in+1, L)
        x = xa[:c_in]                                            # residual (c_in, L)

        # --- 1x1 expand conv (+ bias via ones row) -> ReLU6 ---
        h1 = jnp.dot(w1_ref[...], xa, preferred_element_type=jnp.float32)
        h1 = _relu6(h1)                                          # (c_mid, L)

        # --- depthwise 3x3 'same', stride 1: rolls * precomputed masked planes ---
        acc = h1 * dwp_ref[4]                                    # center tap (d == 0)
        for k, d in enumerate(shifts):
            if d == 0:
                continue
            # shifted[p] = h1[(p + d) mod L]; out-of-image taps are zeroed by
            # the per-image boundary mask baked into dwp_ref[k].
            tap = pltpu.roll(h1, shift=(-d) % L, axis=1)
            acc = acc + tap * dwp_ref[k]

        b2 = bias_ref[:c_mid]                                    # (c_mid, 1)
        b3 = bias_ref[c_mid:]                                    # (c_out, 1)
        h2 = _relu6(acc + b2)                                    # (c_mid, L)

        # --- 1x1 project conv (+ folded BN bias), identity shortcut ---
        h3 = jnp.dot(w3_ref[...], h2, preferred_element_type=jnp.float32)
        o_ref[...] = h3 + b3 + x

    return kernel


# ----------------------------------------------------------------------------
# Wrapper
# ----------------------------------------------------------------------------

def _build_dw_planes(dw_eff, H, W, bn):
    """dw_eff: (Cmid, 3, 3) BN-scale-folded depthwise weights.
    Returns (9, Cmid, bn*H*W) per-tap masked weight planes (per-image masks)."""
    c_mid = dw_eff.shape[0]
    HW = H * W
    yy, xx = jnp.meshgrid(jnp.arange(H), jnp.arange(W), indexing="ij")
    yy = yy.reshape(-1)
    xx = xx.reshape(-1)
    planes = []
    for ky in range(3):
        for kx in range(3):
            dy, dx = ky - 1, kx - 1
            valid = jnp.ones((HW,), jnp.float32)
            if dy == -1:
                valid = valid * (yy >= 1).astype(jnp.float32)
            if dy == 1:
                valid = valid * (yy <= H - 2).astype(jnp.float32)
            if dx == -1:
                valid = valid * (xx >= 1).astype(jnp.float32)
            if dx == 1:
                valid = valid * (xx <= W - 2).astype(jnp.float32)
            planes.append(dw_eff[:, ky, kx][:, None] * valid[None, :])  # (Cmid, HW)
    planes = jnp.stack(planes, axis=0)                # (9, Cmid, HW)
    return jnp.tile(planes, (1, 1, bn))               # (9, Cmid, bn*HW)


def mobile_inverted_residual_block(x_nchw, folded_params, H, W, images_per_step=None):
    """x_nchw: (N, Cin, H, W) float32.  Returns (N, Cout, H, W) float32."""
    N, Cin, Hh, Ww = x_nchw.shape
    assert (Hh, Ww) == (H, W)
    w1_eff, b1, dw_eff, b2, w3_eff, b3 = folded_params
    Cmid = w1_eff.shape[0]
    Cout = w3_eff.shape[0]
    if Cout != Cin:
        # Identity shortcut of the PyTorch block requires matching channels.
        raise ValueError("identity shortcut requires in_channels == out_channels")
    HW = H * W

    # Images per grid step: largest divisor of N up to 8 (amortizes the
    # ~0.35 us per-step overhead; lane width bn*HW stays a multiple of 128).
    if images_per_step is None:
        bn = 1
        for cand in range(min(N, 8), 0, -1):
            if N % cand == 0:
                bn = cand
                break
    else:
        bn = images_per_step
        assert N % bn == 0
    L = bn * HW
    n_steps = N // bn

    # ---- one-time packing (constant-folded under jit for fixed params) ----
    # NCHW -> (Cin, N*HW) lane-dense; augment with a ones row so the expand
    # conv's folded-BN bias rides inside the matmul.
    x_flat = x_nchw.transpose(1, 0, 2, 3).reshape(Cin, N * HW)
    x_aug = jnp.concatenate(
        [x_flat, jnp.ones((1, N * HW), jnp.float32)], axis=0)          # (Cin+1, N*HW)
    w1_aug = jnp.concatenate([w1_eff, b1], axis=1)                      # (Cmid, Cin+1)
    biases = jnp.concatenate([b2, b3], axis=0)                          # (Cmid+Cout, 1)
    dw_planes = _build_dw_planes(dw_eff, H, W, bn)                      # (9, Cmid, L)

    kernel = _make_kernel(H, W, bn, Cin, Cmid, Cout)

    out_flat = pl.pallas_call(
        kernel,
        out_shape=jax.ShapeDtypeStruct((Cout, N * HW), jnp.float32),
        grid_spec=pltpu.PrefetchScalarGridSpec(
            num_scalar_prefetch=0,
            grid=(n_steps,),
            in_specs=[
                pl.BlockSpec((Cin + 1, L), lambda i: (0, i)),        # x slab per step
                pl.BlockSpec((Cmid, Cin + 1), lambda i: (0, 0)),     # resident params
                pl.BlockSpec((9, Cmid, L), lambda i: (0, 0, 0)),
                pl.BlockSpec((Cout, Cmid), lambda i: (0, 0)),
                pl.BlockSpec((Cmid + Cout, 1), lambda i: (0, 0)),
            ],
            out_specs=pl.BlockSpec((Cout, L), lambda i: (0, i)),
        ),
        compiler_params=pltpu.CompilerParams(
            dimension_semantics=("parallel",)),
    )(x_aug, w1_aug, dw_planes, w3_eff, biases)

    # (Cout, N*HW) -> NCHW
    return out_flat.reshape(Cout, N, H, W).transpose(1, 0, 2, 3)


# ----------------------------------------------------------------------------
# Parameter construction (PyTorch-style raw params), BN folding, and reference
# ----------------------------------------------------------------------------

def _fold_bn(gamma, beta, mean, var, eps=1e-5):
    scale = gamma / jnp.sqrt(var + eps)
    bias = beta - mean * scale
    return scale, bias


def make_raw_params(key, c_in, c_out, expand_ratio=6, kernel_size=3):
    c_mid = round(c_in * expand_ratio)
    ks = jax.random.split(key, 6)

    def bn(k, c):
        kg, kb, km, kv = jax.random.split(k, 4)
        gamma = 0.5 + jax.random.uniform(kg, (c,), jnp.float32)
        beta = 0.1 * jax.random.normal(kb, (c,), jnp.float32)
        mean = 0.1 * jax.random.normal(km, (c,), jnp.float32)
        var = 0.5 + jax.random.uniform(kv, (c,), jnp.float32)
        return (gamma, beta, mean, var)

    w1 = 0.1 * jax.random.normal(ks[0], (c_mid, c_in), jnp.float32)       # 1x1 expand
    dw = 0.1 * jax.random.normal(ks[1], (c_mid, kernel_size, kernel_size),
                                 jnp.float32)                             # depthwise
    w3 = 0.1 * jax.random.normal(ks[2], (c_out, c_mid), jnp.float32)      # 1x1 project
    return (w1, dw, w3, bn(ks[3], c_mid), bn(ks[4], c_mid), bn(ks[5], c_out))


def fold_params(raw):
    """Fold BN scales into conv weights; keep per-channel bias columns."""
    w1, dw, w3, bn1, bn2, bn3 = raw
    s1, c1 = _fold_bn(*bn1)
    s2, c2 = _fold_bn(*bn2)
    s3, c3 = _fold_bn(*bn3)
    w1_eff = w1 * s1[:, None]
    dw_eff = dw * s2[:, None, None]          # (Cmid, 3, 3)
    w3_eff = w3 * s3[:, None]
    return (w1_eff, c1[:, None], dw_eff, c2[:, None], w3_eff, c3[:, None])


def reference_nchw(x, raw):
    """Pure-JAX NCHW reference using raw conv weights + explicit BN."""
    w1, dw, w3, bn1, bn2, bn3 = raw
    c_mid = w1.shape[0]
    hp = lax.Precision.HIGHEST

    def bn_apply(h, bn):
        g, b, m, v = bn
        inv = g / jnp.sqrt(v + 1e-5)
        return ((h - m[None, :, None, None]) * inv[None, :, None, None]
                + b[None, :, None, None])

    h = lax.conv_general_dilated(
        x, w1[:, :, None, None], (1, 1), 'VALID',
        dimension_numbers=('NCHW', 'OIHW', 'NCHW'), precision=hp)
    h = _relu6(bn_apply(h, bn1))
    h = lax.conv_general_dilated(
        h, dw[:, None, :, :], (1, 1), 'SAME',
        dimension_numbers=('NCHW', 'OIHW', 'NCHW'),
        feature_group_count=c_mid, precision=hp)
    h = _relu6(bn_apply(h, bn2))
    h = lax.conv_general_dilated(
        h, w3[:, :, None, None], (1, 1), 'VALID',
        dimension_numbers=('NCHW', 'OIHW', 'NCHW'), precision=hp)
    h = bn_apply(h, bn3)
    return h + x


if __name__ == "__main__":
    key = jax.random.PRNGKey(0)
    kx, kp = jax.random.split(key)

    N, C, H, W = 2, 4, 16, 16   # PyTorch-style NCHW shape
    x_nchw = jax.random.normal(kx, (N, C, H, W), jnp.float32)

    raw = make_raw_params(kp, c_in=C, c_out=C, expand_ratio=6, kernel_size=3)
    folded = fold_params(raw)

    out_nchw = mobile_inverted_residual_block(x_nchw, folded, H, W)
    out_nchw = jax.block_until_ready(out_nchw)

    ref = reference_nchw(x_nchw, raw)
    assert out_nchw.shape == (N, C, H, W)
    assert jnp.allclose(out_nchw, ref, atol=1e-3, rtol=1e-3), (
        "kernel output mismatch vs pure-JAX reference")

    print("KERNEL_OK")
</pallas_src>

<mosaic_0001>
module attributes {stable_mosaic.version = 11 : i64} {
  func.func @kernel(%arg0: i32, %arg1: memref<5x512xf32, #tpu.memory_space<vmem>>, %arg2: memref<24x5xf32, #tpu.memory_space<vmem>>, %arg3: memref<9x24x512xf32, #tpu.memory_space<vmem>>, %arg4: memref<4x24xf32, #tpu.memory_space<vmem>>, %arg5: memref<28x1xf32, #tpu.memory_space<vmem>>, %arg6: memref<4x512xf32, #tpu.memory_space<vmem>>) attributes {dimension_semantics = [#tpu.dimension_semantics<parallel>], iteration_bounds = array<i64: 1>, scalar_prefetch = 0 : i64, scratch_operands = 0 : i64, tpu.core_type = #tpu.core_type<tc>, window_params = [{transform_indices = @transform_0, window_bounds = array<i64: 5, 512>}, {pipeline_mode = #tpu.pipeline_mode<synchronous>, transform_indices = @transform_1, window_bounds = array<i64: 24, 5>}, {pipeline_mode = #tpu.pipeline_mode<synchronous>, transform_indices = @transform_2, window_bounds = array<i64: 9, 24, 512>}, {pipeline_mode = #tpu.pipeline_mode<synchronous>, transform_indices = @transform_3, window_bounds = array<i64: 4, 24>}, {pipeline_mode = #tpu.pipeline_mode<synchronous>, transform_indices = @transform_4, window_bounds = array<i64: 28, 1>}, {transform_indices = @transform_5, window_bounds = array<i64: 4, 512>}]} {
    %c0 = arith.constant 0 : index
    %c0_0 = arith.constant 0 : index
    %0 = vector.load %arg1[%c0, %c0_0] : memref<5x512xf32, #tpu.memory_space<vmem>>, vector<5x512xf32>
    %1 = vector.extract_strided_slice %0 {offsets = [0, 0], sizes = [4, 512], strides = [1, 1]} : vector<5x512xf32> to vector<4x512xf32>
    %c0_1 = arith.constant 0 : index
    %c0_2 = arith.constant 0 : index
    %2 = vector.load %arg2[%c0_1, %c0_2] : memref<24x5xf32, #tpu.memory_space<vmem>>, vector<24x5xf32>
    %cst = arith.constant dense<0.000000e+00> : vector<24x512xf32>
    %3 = tpu.matmul %2, %0, %cst {dimension_numbers = #tpu.dot_dimension_numbers<[1], [0], [0], [1], [0, 0, 1, 1], [], []>} : vector<24x5xf32>, vector<5x512xf32>, vector<24x512xf32> -> vector<24x512xf32>
    %cst_3 = arith.constant 0.000000e+00 : f32
    %4 = vector.broadcast %cst_3 : f32 to vector<24x512xf32>
    %5 = arith.maximumf %3, %4 : vector<24x512xf32>
    %cst_4 = arith.constant 6.000000e+00 : f32
    %6 = vector.broadcast %cst_4 : f32 to vector<24x512xf32>
    %7 = arith.minimumf %5, %6 : vector<24x512xf32>
    %c4 = arith.constant 4 : index
    %c0_5 = arith.constant 0 : index
    %c0_6 = arith.constant 0 : index
    %8 = vector.load %arg3[%c4, %c0_5, %c0_6] : memref<9x24x512xf32, #tpu.memory_space<vmem>>, vector<1x24x512xf32>
    %9 = vector.shape_cast %8 : vector<1x24x512xf32> to vector<24x512xf32>
    %10 = arith.mulf %7, %9 : vector<24x512xf32>
    %c17_i32 = arith.constant 17 : i32
    %11 = tpu.dynamic_rotate %7 by %c17_i32 dim 1 : vector<24x512xf32>, i32 -> vector<24x512xf32>
    %c0_7 = arith.constant 0 : index
    %c0_8 = arith.constant 0 : index
    %c0_9 = arith.constant 0 : index
    %12 = vector.load %arg3[%c0_7, %c0_8, %c0_9] : memref<9x24x512xf32, #tpu.memory_space<vmem>>, vector<1x24x512xf32>
    %13 = vector.shape_cast %12 : vector<1x24x512xf32> to vector<24x512xf32>
    %14 = arith.mulf %11, %13 : vector<24x512xf32>
    %15 = arith.addf %10, %14 : vector<24x512xf32>
    %c16_i32 = arith.constant 16 : i32
    %16 = tpu.dynamic_rotate %7 by %c16_i32 dim 1 : vector<24x512xf32>, i32 -> vector<24x512xf32>
    %c1 = arith.constant 1 : index
    %c0_10 = arith.constant 0 : index
    %c0_11 = arith.constant 0 : index
    %17 = vector.load %arg3[%c1, %c0_10, %c0_11] : memref<9x24x512xf32, #tpu.memory_space<vmem>>, vector<1x24x512xf32>
    %18 = vector.shape_cast %17 : vector<1x24x512xf32> to vector<24x512xf32>
    %19 = arith.mulf %16, %18 : vector<24x512xf32>
    %20 = arith.addf %15, %19 : vector<24x512xf32>
    %c15_i32 = arith.constant 15 : i32
    %21 = tpu.dynamic_rotate %7 by %c15_i32 dim 1 : vector<24x512xf32>, i32 -> vector<24x512xf32>
    %c2 = arith.constant 2 : index
    %c0_12 = arith.constant 0 : index
    %c0_13 = arith.constant 0 : index
    %22 = vector.load %arg3[%c2, %c0_12, %c0_13] : memref<9x24x512xf32, #tpu.memory_space<vmem>>, vector<1x24x512xf32>
    %23 = vector.shape_cast %22 : vector<1x24x512xf32> to vector<24x512xf32>
    %24 = arith.mulf %21, %23 : vector<24x512xf32>
    %25 = arith.addf %20, %24 : vector<24x512xf32>
    %c1_i32 = arith.constant 1 : i32
    %26 = tpu.dynamic_rotate %7 by %c1_i32 dim 1 : vector<24x512xf32>, i32 -> vector<24x512xf32>
    %c3 = arith.constant 3 : index
    %c0_14 = arith.constant 0 : index
    %c0_15 = arith.constant 0 : index
    %27 = vector.load %arg3[%c3, %c0_14, %c0_15] : memref<9x24x512xf32, #tpu.memory_space<vmem>>, vector<1x24x512xf32>
    %28 = vector.shape_cast %27 : vector<1x24x512xf32> to vector<24x512xf32>
    %29 = arith.mulf %26, %28 : vector<24x512xf32>
    %30 = arith.addf %25, %29 : vector<24x512xf32>
    %c511_i32 = arith.constant 511 : i32
    %31 = tpu.dynamic_rotate %7 by %c511_i32 dim 1 : vector<24x512xf32>, i32 -> vector<24x512xf32>
    %c5 = arith.constant 5 : index
    %c0_16 = arith.constant 0 : index
    %c0_17 = arith.constant 0 : index
    %32 = vector.load %arg3[%c5, %c0_16, %c0_17] : memref<9x24x512xf32, #tpu.memory_space<vmem>>, vector<1x24x512xf32>
    %33 = vector.shape_cast %32 : vector<1x24x512xf32> to vector<24x512xf32>
    %34 = arith.mulf %31, %33 : vector<24x512xf32>
    %35 = arith.addf %30, %34 : vector<24x512xf32>
    %c497_i32 = arith.constant 497 : i32
    %36 = tpu.dynamic_rotate %7 by %c497_i32 dim 1 : vector<24x512xf32>, i32 -> vector<24x512xf32>
    %c6 = arith.constant 6 : index
    %c0_18 = arith.constant 0 : index
    %c0_19 = arith.constant 0 : index
    %37 = vector.load %arg3[%c6, %c0_18, %c0_19] : memref<9x24x512xf32, #tpu.memory_space<vmem>>, vector<1x24x512xf32>
    %38 = vector.shape_cast %37 : vector<1x24x512xf32> to vector<24x512xf32>
    %39 = arith.mulf %36, %38 : vector<24x512xf32>
    %40 = arith.addf %35, %39 : vector<24x512xf32>
    %c496_i32 = arith.constant 496 : i32
    %41 = tpu.dynamic_rotate %7 by %c496_i32 dim 1 : vector<24x512xf32>, i32 -> vector<24x512xf32>
    %c7 = arith.constant 7 : index
    %c0_20 = arith.constant 0 : index
    %c0_21 = arith.constant 0 : index
    %42 = vector.load %arg3[%c7, %c0_20, %c0_21] : memref<9x24x512xf32, #tpu.memory_space<vmem>>, vector<1x24x512xf32>
    %43 = vector.shape_cast %42 : vector<1x24x512xf32> to vector<24x512xf32>
    %44 = arith.mulf %41, %43 : vector<24x512xf32>
    %45 = arith.addf %40, %44 : vector<24x512xf32>
    %c495_i32 = arith.constant 495 : i32
    %46 = tpu.dynamic_rotate %7 by %c495_i32 dim 1 : vector<24x512xf32>, i32 -> vector<24x512xf32>
    %c8 = arith.constant 8 : index
    %c0_22 = arith.constant 0 : index
    %c0_23 = arith.constant 0 : index
    %47 = vector.load %arg3[%c8, %c0_22, %c0_23] : memref<9x24x512xf32, #tpu.memory_space<vmem>>, vector<1x24x512xf32>
    %48 = vector.shape_cast %47 : vector<1x24x512xf32> to vector<24x512xf32>
    %49 = arith.mulf %46, %48 : vector<24x512xf32>
    %50 = arith.addf %45, %49 : vector<24x512xf32>
    %c0_24 = arith.constant 0 : index
    %c0_25 = arith.constant 0 : index
    %51 = vector.load %arg5[%c0_24, %c0_25] : memref<28x1xf32, #tpu.memory_space<vmem>>, vector<24x1xf32>
    %c24 = arith.constant 24 : index
    %c0_26 = arith.constant 0 : index
    %52 = vector.load %arg5[%c24, %c0_26] : memref<28x1xf32, #tpu.memory_space<vmem>>, vector<4x1xf32>
    %53 = vector.broadcast %51 : vector<24x1xf32> to vector<24x512xf32>
    %54 = arith.addf %50, %53 : vector<24x512xf32>
    %cst_27 = arith.constant 0.000000e+00 : f32
    %55 = vector.broadcast %cst_27 : f32 to vector<24x512xf32>
    %56 = arith.maximumf %54, %55 : vector<24x512xf32>
    %cst_28 = arith.constant 6.000000e+00 : f32
    %57 = vector.broadcast %cst_28 : f32 to vector<24x512xf32>
    %58 = arith.minimumf %56, %57 : vector<24x512xf32>
    %c0_29 = arith.constant 0 : index
    %c0_30 = arith.constant 0 : index
    %59 = vector.load %arg4[%c0_29, %c0_30] : memref<4x24xf32, #tpu.memory_space<vmem>>, vector<4x24xf32>
    %cst_31 = arith.constant dense<0.000000e+00> : vector<4x512xf32>
    %60 = tpu.matmul %59, %58, %cst_31 {dimension_numbers = #tpu.dot_dimension_numbers<[1], [0], [0], [1], [0, 0, 1, 1], [], []>} : vector<4x24xf32>, vector<24x512xf32>, vector<4x512xf32> -> vector<4x512xf32>
    %61 = vector.broadcast %52 : vector<4x1xf32> to vector<4x512xf32>
    %62 = arith.addf %60, %61 : vector<4x512xf32>
    %63 = arith.addf %62, %1 : vector<4x512xf32>
    %c0_32 = arith.constant 0 : index
    %c0_33 = arith.constant 0 : index
    %64 = vector.load %arg6[%c0_32, %c0_33] : memref<4x512xf32, #tpu.memory_space<vmem>>, vector<4x512xf32>
    tpu.vector_store %arg6[%c0_32, %c0_33], %63 {strides = array<i32>} : memref<4x512xf32, #tpu.memory_space<vmem>>, vector<4x512xf32>,
    return
  }
  func.func @transform_0(%arg0: i32) -> (i32, i32) {
    %c0_i32 = arith.constant 0 : i32
    %c0_i32_0 = arith.constant 0 : i32
    return %c0_i32, %arg0 : i32, i32
  }
  func.func @transform_1(%arg0: i32) -> (i32, i32) {
    %c0_i32 = arith.constant 0 : i32
    %c0_i32_0 = arith.constant 0 : i32
    %c0_i32_1 = arith.constant 0 : i32
    return %c0_i32, %c0_i32_0 : i32, i32
  }
  func.func @transform_2(%arg0: i32) -> (i32, i32, i32) {
    %c0_i32 = arith.constant 0 : i32
    %c0_i32_0 = arith.constant 0 : i32
    %c0_i32_1 = arith.constant 0 : i32
    %c0_i32_2 = arith.constant 0 : i32
    return %c0_i32, %c0_i32_0, %c0_i32_1 : i32, i32, i32
  }
  func.func @transform_3(%arg0: i32) -> (i32, i32) {
    %c0_i32 = arith.constant 0 : i32
    %c0_i32_0 = arith.constant 0 : i32
    %c0_i32_1 = arith.constant 0 : i32
    return %c0_i32, %c0_i32_0 : i32, i32
  }
  func.func @transform_4(%arg0: i32) -> (i32, i32) {
    %c0_i32 = arith.constant 0 : i32
    %c0_i32_0 = arith.constant 0 : i32
    %c0_i32_1 = arith.constant 0 : i32
    return %c0_i32, %c0_i32_0 : i32, i32
  }
  func.func @transform_5(%arg0: i32) -> (i32, i32) {
    %c0_i32 = arith.constant 0 : i32
    %c0_i32_0 = arith.constant 0 : i32
    return %c0_i32, %arg0 : i32, i32
  }
}

</mosaic_0001>

<bundles_post_ra>
// kernel: tpu_custom_call.1
= control target key start
LH: loop header
LB: loop body
LE: loop exit
PB: predicated region body
PF: predicated region fallthrough
CT: control target
= control target key end

     0   :  { %10 = vsyncpa [#allocation3], 0  ;;  %s2006_s0 = inlined_call_operand.vmem [shape: f32[5,512], index: 0, kind: input, shape index: {}]   ;;  %s2007_s1 = inlined_call_operand.vmem [shape: f32[24,5], index: 1, kind: input, shape index: {}]   ;;  %s2008_s2 = inlined_call_operand.hbm [shape: f32[9,24,512], index: 2, kind: input, shape index: {}]   ;;  %s2009_s3 = inlined_call_operand.vmem [shape: f32[4,24], index: 3, kind: input, shape index: {}]   ;;  %s2010_s4 = inlined_call_operand.vmem [shape: f32[28,1], index: 4, kind: input, shape index: {}]   ;;  %s2011_s5 = inlined_call_operand.hbm [shape: f32[4,512], index: 5, kind: output, shape index: {}]  }
   0x1   :  { %11 = vsyncpa [#allocation4], 0  ;;  %s1197_s18 = smov [#allocation2]   ;;  %s1149_s22 = scalar_lea.hbm %s2008_s2, 13824 }
   0x2   :  { %s21_s19 = sshll.u32 %s1197_s18, 4  ;;  %p1150_p0 = scmp.ne.s32.totalorder %s2008_s2, %s1149_s22  ;;  %s22_s19 = int_to_ptr.vmem [resolvable:$true] %s21_s19 }
   0x3   :  { %p1153_p1 = scmp.lt.u32.totalorder %s1149_s22, %s2008_s2 }
   0x5   :  { %p1155_p2 = pnand %p1153_p1, %p1150_p0 }
   0x7   :  { %1158 = shalt.err (!%p1155_p2)
}
   0x8   :  { %s1159_s27 = scalar_lea.vmem %s22_s19, 13824  ;;  %p1164_p4 = scmp.lt.s32.totalorder %s22_s19, %s22_s19 }
   0x9   :  { %p1160_p3 = scmp.ne.s32.totalorder %s22_s19, %s1159_s27  ;;  %p1165_p5 = scmp.lt.s32.totalorder %s1159_s27, %s1159_s27 }
   0xb   :  { %p1166_p6 = por %p1165_p5, %p1164_p4 }
   0xd   :  { %p1167_p7 = pnand %p1166_p6, %p1160_p3 }
   0xf   :  { %1170 = shalt.err (!%p1167_p7)
}
  0x10   :  { %s1198_s28 = smov 512   ;;  %s1199_s29 = smov 32  }
  0x11   :  { %27 = dma.hbm_to_vmem [thread:$0]  %s2008_s2, 13824, %s22_s19, [#allocation3], %s1198_s28, %s1198_s28, %s1199_s29  }
  0x12   :  { %1193 = dma.done.wait [#allocation3], 13824  }
  0x13   :  { %1194 = vsyncadd [#allocation3], 4294953472  ;;  %v1200_v0 = vmov 0.0   ;;  %v1201_v1 = vmov 0   ;;  %vm52_vm0 = vcmask 1044480   ;;  %v39_v4 = vld [vmem:[%s2007_s1] sm:$0xff]  ;;  %v304_v43 = vlaneseq }
  0x14   :  { %129 = vmatprep.mubr.f32.mxu0 %v1200_v0  ;;  %212 = vmatprep.mubr.f32.mxu1 %v1200_v0  ;;  %v36_v2 = vld [vmem:[%s2006_s0 + $0x8] sm:$0x1f]  ;;  %v35_v3 = vld [vmem:[%s2006_s0] sm:$0x1f]  ;;  %vm42_vm1 = vcmask 39936   ;;  %v875_v10 = vld [vmem:[%s2010_s4 + $0x10] sm:$0xff] }
  0x15   :  { %1144 = vset.pattern.permute.xlu1 %v1201_v1  ;;  %1143 = vset.pattern.permute.xlu0 %v1201_v1  ;;  %v38_v5 = vld [vmem:[%s2006_s0 + $0x18] sm:$0x1f]  ;;  %v37_v6 = vld [vmem:[%s2006_s0 + $0x10] sm:$0x1f]  ;;  %v874_v7 = vld [vmem:[%s2010_s4 + $0x8] sm:$0xff]  ;;  %s1203_s26 = smov 17  }
  0x16   :  { %1109 = vmatprep.subr.msk.mxu0 %vm52_vm0, %v36_v2  ;;  %1114 = vmatprep.subr.msk.mxu1 %vm52_vm0, %v38_v5  ;;  %v873_v8 = vld [vmem:[%s2010_s4] sm:$0xff]  ;;  %v40_v9 = vld [vmem:[%s2007_s1 + $0x8] sm:$0xff]  ;;  %v41_v11 = vld [vmem:[%s2007_s1 + $0x10] sm:$0xff]  ;;  %s1202_s1 = smov 111   ;;  %s1204_s27 = smov 16   ;;  %v1441_v46 = vand.u32 127, %v304_v43 }
  0x17   :  { %1110 = vmatpush1.msk.msra.mxu0 %vm52_vm0, %v35_v3  ;;  %1115 = vmatpush1.msk.msra.mxu1 %vm52_vm0, %v37_v6  ;;  %s1205_s28 = smov 15   ;;  %s1206_s29 = smov 1   ;;  %v258_v50 = vld [vmem:[#allocation2 + $0x190] sm:$0xff]  ;;  %vm934_vm10 = vcmask 195584  }
  0x18   :  { %1111 = vmatmul.mubr.msk.f32.vlgmr.msra.gmra.mrb[0].mxu0 %vm42_vm1, %v39_v4  ;;  %1116 = vmatmul.mubr.msk.f32.vlgmr.msra.gmra.mrb[0].mxu1 %vm42_vm1, %v39_v4  ;;  %s1207_s30 = smov 127   ;;  %s1208_s6 = smov 113   ;;  %vm306_vm2 = vcmp.lt.s32.totalorder %v1441_v46, 17  ;;  %v321_v51 = vld [vmem:[#allocation2 + $0x10] sm:$0xff]  ;;  %vm823_vm3 = vcmp.lt.s32.totalorder %v1441_v46, 111  ;;  %vm379_vm4 = vcmp.lt.s32.totalorder %v1441_v46, 16 }
  0x19   :  { %135 = vmatprep.mubr.f32.mxu0 %v1200_v0  ;;  %218 = vmatprep.mubr.f32.mxu1 %v1200_v0  ;;  %s1209_s7 = smov 112   ;;  %vm453_vm5 = vcmp.lt.s32.totalorder %v1441_v46, 15  ;;  %vm527_vm6 = vcmp.lt.s32.totalorder %v1441_v46, 1  ;;  %vm601_vm7 = vcmp.lt.s32.totalorder %v1441_v46, 127  ;;  %vm675_vm8 = vcmp.lt.s32.totalorder %v1441_v46, 113  ;;  %s1210_s15 = smov [#allocation5]  }
  0x1a   :  { %884 = vperm.xlu1 %1144, %v874_v7   ;;  %879 = vperm.xlu0 %1143, %v873_v8   ;;  %vm749_vm9 = vcmp.lt.s32.totalorder %v1441_v46, 112  ;;  %s1100_s16 = sshll.u32 %s1210_s15, 4  ;;  %s1101_s16 = int_to_ptr.vmem [resolvable:$true] %s1100_s16 }
  0x1b   :  { %s1171_s19 = scalar_lea.vmem %s1101_s16, 256  ;;  %p1176_p9 = scmp.lt.s32.totalorder %s1101_s16, %s1101_s16 }
  0x1c   :  { %1112 = vmatmul.mubr.msk.f32.gmra.mrb[2].mxu0 %vm42_vm1, %v40_v9  ;;  %1117 = vmatmul.mubr.msk.f32.gmra.mrb[2].mxu1 %vm42_vm1, %v40_v9  ;;  %p1172_p8 = scmp.ne.s32.totalorder %s1101_s16, %s1171_s19  ;;  %p1177_p10 = scmp.lt.s32.totalorder %s1171_s19, %s1171_s19 }
  0x1d   :  { %141 = vmatprep.mubr.f32.mxu0 %v1200_v0  ;;  %224 = vmatprep.mubr.f32.mxu1 %v1200_v0 }
  0x1e   :  { %889 = vperm.xlu1 %1144, %v875_v10   ;;  %p1178_p11 = por %p1177_p10, %p1176_p9 }
  0x20   :  { %1113 = vmatmul.mubr.msk.f32.gmra.mrb[4].mxu0 %vm42_vm1, %v41_v11  ;;  %1118 = vmatmul.mubr.msk.f32.gmra.mrb[4].mxu1 %vm42_vm1, %v41_v11  ;;  %p1179_p12 = pnand %p1178_p11, %p1172_p8 }
  0x21   :  { %1002 = vmatprep.mubr.f32.mxu0 %v1200_v0  ;;  %1073 = vmatprep.mubr.f32.mxu1 %v1200_v0 }
  0x99   :  { %v1417_v40 = vpop.permute.xlu1 %884  ;;  %v1427_v41 = vpop.permute.xlu0 %879 }
  0x9d   :  { %v1429_v42 = vpop.permute.xlu1 %889 }
  0x9e   :  { %2013 = vst [vmem:[#allocation8_spill] sm:$0xff] %v1429_v42 }
  0xeb   :  { %v131_v12 = vpop.f32.mrb[0].mxu0  ;;  %v214_v15 = vpop.f32.mrb[0].mxu1 }
  0xec   :  { %v231_v13 = vmax.f32 %v131_v12, 0.0  ;;  %v133_v14 = vpop.f32.mrb[1].mxu0  ;;  %v233_v16 = vmax.f32 %v214_v15, 0.0  ;;  %v216_v17 = vpop.f32.mrb[1].mxu1 }
  0xed   :  { %v232_v24 = vmax.f32 %v133_v14, 0.0  ;;  %v234_v30 = vmax.f32 %v216_v17, 0.0 }
  0xee   :  { %v1289_v18 = vmin.f32 %v231_v13, 6.0  ;;  %v1291_v20 = vmin.f32 %v233_v16, 6.0 }
  0xef   :  { %v137_v19 = vpop.f32.mrb[2].mxu0  ;;  %v220_v21 = vpop.f32.mrb[2].mxu1  ;;  %v1309_v29 = vmin.f32 %v232_v24, 6.0  ;;  %v1319_v32 = vmin.f32 %v234_v30, 6.0  ;;  %v320_v30 = vld [vmem:[#allocation2 + $0x8] sm:$0xff] }
  0xf0   :  { %799 = vrot.lane.b32.xlu1 %v1289_v18, %s1202_s1  ;;  %280 = vrot.lane.b32.xlu0 %v1289_v18, %s1203_s26  ;;  %v139_v22 = vpop.f32.mrb[3].mxu0  ;;  %v222_v23 = vpop.f32.mrb[3].mxu1  ;;  %v237_v31 = vmax.f32 %v220_v21, 0.0  ;;  %v235_v34 = vmax.f32 %v137_v19, 0.0  ;;  %v270_v56 = vmul.f32 %v258_v50, %v1291_v20 }
  0xf1   :  { %v236_v36 = vmax.f32 %v139_v22, 0.0  ;;  %v238_v37 = vmax.f32 %v222_v23, 0.0 }
  0xf2   :  { %v1321_v33 = vmin.f32 %v237_v31, 6.0  ;;  %v1327_v35 = vmin.f32 %v235_v34, 6.0  ;;  %v256_v31 = vld [vmem:[#allocation2 + $0x180] sm:$0xff] }
  0xf3   :  { %v1297_v25 = vpop.f32.mrb[4].mxu0  ;;  %v1305_v27 = vpop.f32.mrb[4].mxu1  ;;  %v1381_v38 = vmin.f32 %v236_v36, 6.0  ;;  %v1387_v39 = vmin.f32 %v238_v37, 6.0  ;;  %v319_v34 = vld [vmem:[#allocation2] sm:$0xff]  ;;  %v257_v36 = vld [vmem:[#allocation2 + $0x188] sm:$0xff] }
  0xf4   :  { %811 = vrot.lane.b32.xlu1 %v1291_v20, %s1202_s1  ;;  %292 = vrot.lane.b32.xlu0 %v1291_v20, %s1203_s26  ;;  %v1303_v26 = vpop.f32.mrb[5].mxu0  ;;  %v1307_v28 = vpop.f32.mrb[5].mxu1  ;;  %v239_v49 = vmax.f32 %v1297_v25, 0.0  ;;  %v241_v59 = vmax.f32 %v1305_v27, 0.0 }
  0xf5   :  { %v240_v12 = vmax.f32 %v1303_v26, 0.0  ;;  %v242_v16 = vmax.f32 %v1307_v28, 0.0 }
  0xf6   :  { %v1463_v58 = vmin.f32 %v239_v49, 6.0  ;;  %v1482_v1 = vmin.f32 %v241_v59, 6.0  ;;  %v268_v49 = vmul.f32 %v256_v31, %v1289_v18  ;;  %v396_v31 = vld [vmem:[#allocation2 + $0x78] sm:$0xff] }
  0xf7   :  { %v1535_v15 = vmin.f32 %v240_v12, 6.0 }
  0xf8   :  { %355 = vrot.lane.b32.xlu0 %v1289_v18, %s1204_s27  ;;  %286 = vrot.lane.b32.xlu1 %v1309_v29, %s1203_s26 }
  0xfc   :  { %367 = vrot.lane.b32.xlu0 %v1291_v20, %s1204_s27  ;;  %805 = vrot.lane.b32.xlu1 %v1309_v29, %s1202_s1 }
 0x100   :  { %429 = vrot.lane.b32.xlu0 %v1289_v18, %s1205_s28  ;;  %817 = vrot.lane.b32.xlu1 %v1319_v32, %s1202_s1 }
 0x104   :  { %441 = vrot.lane.b32.xlu0 %v1291_v20, %s1205_s28  ;;  %294 = vrot.lane.b32.xlu1 %v1321_v33, %s1203_s26 }
 0x108   :  { %503 = vrot.lane.b32.xlu0 %v1289_v18, %s1206_s29  ;;  %357 = vrot.lane.b32.xlu1 %v1327_v35, %s1204_s27 }
 0x10c   :  { %515 = vrot.lane.b32.xlu0 %v1291_v20, %s1206_s29  ;;  %369 = vrot.lane.b32.xlu1 %v1321_v33, %s1204_s27 }
 0x110   :  { %577 = vrot.lane.b32.xlu0 %v1289_v18, %s1207_s30  ;;  %431 = vrot.lane.b32.xlu1 %v1327_v35, %s1205_s28 }
 0x114   :  { %589 = vrot.lane.b32.xlu0 %v1291_v20, %s1207_s30  ;;  %443 = vrot.lane.b32.xlu1 %v1321_v33, %s1205_s28 }
 0x118   :  { %651 = vrot.lane.b32.xlu0 %v1289_v18, %s1208_s6  ;;  %505 = vrot.lane.b32.xlu1 %v1327_v35, %s1206_s29 }
 0x11c   :  { %663 = vrot.lane.b32.xlu0 %v1291_v20, %s1208_s6  ;;  %517 = vrot.lane.b32.xlu1 %v1321_v33, %s1206_s29 }
 0x120   :  { %725 = vrot.lane.b32.xlu0 %v1289_v18, %s1209_s7  ;;  %579 = vrot.lane.b32.xlu1 %v1327_v35, %s1207_s30 }
 0x124   :  { %737 = vrot.lane.b32.xlu0 %v1291_v20, %s1209_s7  ;;  %591 = vrot.lane.b32.xlu1 %v1321_v33, %s1207_s30  ;;  %v1546_v20 = vmin.f32 %v242_v16, 6.0 }
 0x128   :  { %298 = vrot.lane.b32.xlu0 %v1319_v32, %s1203_s26  ;;  %653 = vrot.lane.b32.xlu1 %v1327_v35, %s1208_s6 }
 0x12c   :  { %361 = vrot.lane.b32.xlu0 %v1309_v29, %s1204_s27  ;;  %665 = vrot.lane.b32.xlu1 %v1321_v33, %s1208_s6 }
 0x130   :  { %373 = vrot.lane.b32.xlu0 %v1319_v32, %s1204_s27  ;;  %727 = vrot.lane.b32.xlu1 %v1327_v35, %s1209_s7 }
 0x134   :  { %435 = vrot.lane.b32.xlu0 %v1309_v29, %s1205_s28  ;;  %739 = vrot.lane.b32.xlu1 %v1321_v33, %s1209_s7 }
 0x138   :  { %447 = vrot.lane.b32.xlu0 %v1319_v32, %s1205_s28  ;;  %288 = vrot.lane.b32.xlu1 %v1381_v38, %s1203_s26 }
 0x13c   :  { %509 = vrot.lane.b32.xlu0 %v1309_v29, %s1206_s29  ;;  %300 = vrot.lane.b32.xlu1 %v1387_v39, %s1203_s26 }
 0x140   :  { %521 = vrot.lane.b32.xlu0 %v1319_v32, %s1206_s29  ;;  %363 = vrot.lane.b32.xlu1 %v1381_v38, %s1204_s27 }
 0x144   :  { %583 = vrot.lane.b32.xlu0 %v1309_v29, %s1207_s30  ;;  %375 = vrot.lane.b32.xlu1 %v1387_v39, %s1204_s27 }
 0x148   :  { %595 = vrot.lane.b32.xlu0 %v1319_v32, %s1207_s30  ;;  %437 = vrot.lane.b32.xlu1 %v1381_v38, %s1205_s28 }
 0x14c   :  { %657 = vrot.lane.b32.xlu0 %v1309_v29, %s1208_s6  ;;  %449 = vrot.lane.b32.xlu1 %v1387_v39, %s1205_s28 }
 0x150   :  { %669 = vrot.lane.b32.xlu0 %v1319_v32, %s1208_s6  ;;  %511 = vrot.lane.b32.xlu1 %v1381_v38, %s1206_s29 }
 0x154   :  { %731 = vrot.lane.b32.xlu0 %v1309_v29, %s1209_s7  ;;  %523 = vrot.lane.b32.xlu1 %v1387_v39, %s1206_s29 }
 0x158   :  { %743 = vrot.lane.b32.xlu0 %v1319_v32, %s1209_s7  ;;  %585 = vrot.lane.b32.xlu1 %v1381_v38, %s1207_s30 }
 0x15c   :  { %282 = vrot.lane.b32.xlu0 %v1327_v35, %s1203_s26  ;;  %597 = vrot.lane.b32.xlu1 %v1387_v39, %s1207_s30 }
 0x160   :  { %801 = vrot.lane.b32.xlu0 %v1327_v35, %s1202_s1  ;;  %659 = vrot.lane.b32.xlu1 %v1381_v38, %s1208_s6 }
 0x162   :  { %v800_v44 = vpop.permute.xlu1 %799  ;;  %v1435_v45 = vpop.permute.xlu0 %280 }
 0x164   :  { %813 = vrot.lane.b32.xlu0 %v1321_v33, %s1202_s1  ;;  %671 = vrot.lane.b32.xlu1 %v1387_v39, %s1208_s6 }
 0x166   :  { %v812_v47 = vpop.permute.xlu1 %811  ;;  %v1443_v48 = vpop.permute.xlu0 %292 }
 0x168   :  { %807 = vrot.lane.b32.xlu0 %v1381_v38, %s1202_s1  ;;  %733 = vrot.lane.b32.xlu1 %v1381_v38, %s1209_s7 }
 0x16a   :  { %v1451_v52 = vpop.permute.xlu0 %355  ;;  %v287_v53 = vpop.permute.xlu1 %286 }
 0x16b   :  { %v310_v54 = vsel %vm306_vm2, %v287_v53, %v1443_v48  ;;  %v1459_v55 = vsel %vm306_vm2, %v1435_v45, %v287_v53  ;;  %v322_v53 = vld [vmem:[#allocation2 + $0x18] sm:$0xff] }
 0x16c   :  { %v333_v57 = vmul.f32 %v321_v51, %v310_v54  ;;  %819 = vrot.lane.b32.xlu0 %v1387_v39, %s1202_s1  ;;  %745 = vrot.lane.b32.xlu1 %v1387_v39, %s1209_s7  ;;  %v269_v51 = vmul.f32 %v257_v36, %v1309_v29 }
 0x16e   :  { %v1470_v60 = vadd.f32 %v333_v57, %v270_v56  ;;  %v1472_v61 = vpop.permute.xlu0 %367  ;;  %v806_v62 = vpop.permute.xlu1 %805 }
 0x16f   :  { %v1476_v63 = vsel %vm823_vm3, %v806_v62, %v812_v47  ;;  %v1480_v0 = vsel %vm823_vm3, %v800_v44, %v806_v62  ;;  %v259_v62 = vld [vmem:[#allocation2 + $0x198] sm:$0xff] }
 0x170   :  { %581 = vrot.lane.b32.xlu1 %v1463_v58, %s1207_s30  ;;  %284 = vrot.lane.b32.xlu0 %v1463_v58, %s1203_s26 }
 0x172   :  { %v1488_v2 = vpop.permute.xlu0 %429  ;;  %v818_v3 = vpop.permute.xlu1 %817 }
 0x173   :  { %v1492_v4 = vsel %vm823_vm3, %v812_v47, %v818_v3  ;;  %v1496_v5 = vsel %vm823_vm3, %v818_v3, %v800_v44  ;;  %v332_v44 = vmul.f32 %v320_v30, %v1459_v55  ;;  %v394_v55 = vld [vmem:[#allocation2 + $0x68] sm:$0xff] }
 0x174   :  { %593 = vrot.lane.b32.xlu1 %v1482_v1, %s1207_s30  ;;  %296 = vrot.lane.b32.xlu0 %v1482_v1, %s1203_s26 }
 0x175   :  { %v344_v59 = vadd.f32 %v332_v44, %v269_v51 }
 0x176   :  { %v1502_v6 = vpop.permute.xlu0 %441  ;;  %v1504_v7 = vpop.permute.xlu1 %294 }
 0x178   :  { %655 = vrot.lane.b32.xlu1 %v1463_v58, %s1208_s6  ;;  %359 = vrot.lane.b32.xlu0 %v1463_v58, %s1204_s27 }
 0x17a   :  { %v1510_v8 = vpop.permute.xlu0 %503  ;;  %v1512_v9 = vpop.permute.xlu1 %357 }
 0x17c   :  { %667 = vrot.lane.b32.xlu1 %v1482_v1, %s1208_s6  ;;  %371 = vrot.lane.b32.xlu0 %v1482_v1, %s1204_s27 }
 0x17e   :  { %v1518_v10 = vpop.permute.xlu0 %515  ;;  %v1520_v11 = vpop.permute.xlu1 %369 }
 0x180   :  { %729 = vrot.lane.b32.xlu1 %v1463_v58, %s1209_s7  ;;  %433 = vrot.lane.b32.xlu0 %v1463_v58, %s1205_s28 }
 0x182   :  { %v1527_v13 = vpop.permute.xlu0 %577  ;;  %v1529_v14 = vpop.permute.xlu1 %431 }
 0x184   :  { %741 = vrot.lane.b32.xlu1 %v1482_v1, %s1209_s7  ;;  %445 = vrot.lane.b32.xlu0 %v1482_v1, %s1205_s28 }
 0x186   :  { %v1538_v17 = vpop.permute.xlu0 %589  ;;  %v1540_v19 = vpop.permute.xlu1 %443 }
 0x188   :  { %507 = vrot.lane.b32.xlu0 %v1463_v58, %s1206_s29  ;;  %290 = vrot.lane.b32.xlu1 %v1535_v15, %s1203_s26 }
 0x18a   :  { %v1548_v21 = vpop.permute.xlu0 %651  ;;  %v1550_v22 = vpop.permute.xlu1 %505 }
 0x18c   :  { %519 = vrot.lane.b32.xlu0 %v1482_v1, %s1206_s29  ;;  %302 = vrot.lane.b32.xlu1 %v1546_v20, %s1203_s26 }
 0x18e   :  { %v1556_v23 = vpop.permute.xlu0 %663  ;;  %v1558_v24 = vpop.permute.xlu1 %517 }
 0x190   :  { %803 = vrot.lane.b32.xlu0 %v1463_v58, %s1202_s1  ;;  %365 = vrot.lane.b32.xlu1 %v1535_v15, %s1204_s27 }
 0x192   :  { %v1564_v25 = vpop.permute.xlu0 %725  ;;  %v1566_v26 = vpop.permute.xlu1 %579 }
 0x194   :  { %587 = vrot.lane.b32.xlu0 %v1535_v15, %s1207_s30  ;;  %377 = vrot.lane.b32.xlu1 %v1546_v20, %s1204_s27 }
 0x196   :  { %v1572_v27 = vpop.permute.xlu0 %737  ;;  %v1574_v28 = vpop.permute.xlu1 %591 }
 0x198   :  { %599 = vrot.lane.b32.xlu0 %v1546_v20, %s1207_s30  ;;  %439 = vrot.lane.b32.xlu1 %v1535_v15, %s1205_s28 }
 0x19a   :  { %v299_v37 = vpop.permute.xlu0 %298  ;;  %v1580_v43 = vpop.permute.xlu1 %653 }
 0x19b   :  { %v316_v47 = vsel %vm306_vm2, %v299_v37, %v1435_v45  ;;  %v307_v54 = vsel %vm306_vm2, %v1443_v48, %v299_v37  ;;  %v395_v45 = vld [vmem:[#allocation2 + $0x70] sm:$0xff]  ;;  %v393_v48 = vld [vmem:[#allocation2 + $0x60] sm:$0xff] }
 0x19c   :  { %v331_v50 = vmul.f32 %v319_v34, %v316_v47  ;;  %661 = vrot.lane.b32.xlu0 %v1535_v15, %s1208_s6  ;;  %451 = vrot.lane.b32.xlu1 %v1546_v20, %s1205_s28  ;;  %v334_v12 = vmul.f32 %v322_v53, %v307_v54  ;;  %v271_v34 = vmul.f32 %v259_v62, %v1319_v32  ;;  %v468_v32 = vld [vmem:[#allocation2 + $0xc8] sm:$0xff] }
 0x19e   :  { %v343_v56 = vadd.f32 %v331_v50, %v268_v49  ;;  %v362_v18 = vpop.permute.xlu0 %361  ;;  %v1596_v57 = vpop.permute.xlu1 %665  ;;  %v346_v51 = vadd.f32 %v334_v12, %v271_v34 }
 0x19f   :  { %v383_v3 = vsel %vm379_vm4, %v362_v18, %v1472_v61  ;;  %v386_v29 = vsel %vm379_vm4, %v1451_v52, %v362_v18 }
 0x1a0   :  { %v406_v16 = vmul.f32 %v394_v55, %v386_v29  ;;  %v407_v30 = vmul.f32 %v395_v45, %v383_v3  ;;  %673 = vrot.lane.b32.xlu0 %v1546_v20, %s1208_s6  ;;  %513 = vrot.lane.b32.xlu1 %v1535_v15, %s1206_s29  ;;  %v470_v29 = vld [vmem:[#allocation2 + $0xd8] sm:$0xff] }
 0x1a2   :  { %v418_v36 = vadd.f32 %v406_v16, %v344_v59  ;;  %v419_v37 = vadd.f32 %v407_v30, %v1470_v60  ;;  %v374_v44 = vpop.permute.xlu0 %373  ;;  %v1610_v47 = vpop.permute.xlu1 %727  ;;  %v469_v60 = vld [vmem:[#allocation2 + $0xd0] sm:$0xff] }
 0x1a3   :  { %v380_v49 = vsel %vm379_vm4, %v1472_v61, %v374_v44  ;;  %v389_v50 = vsel %vm379_vm4, %v374_v44, %v1451_v52 }
 0x1a4   :  { %v405_v53 = vmul.f32 %v393_v48, %v389_v50  ;;  %v408_v54 = vmul.f32 %v396_v31, %v380_v49  ;;  %735 = vrot.lane.b32.xlu0 %v1535_v15, %s1209_s7  ;;  %525 = vrot.lane.b32.xlu1 %v1546_v20, %s1206_s29  ;;  %v325_v50 = vld [vmem:[#allocation2 + $0x30] sm:$0xff] }
 0x1a6   :  { %v417_v55 = vadd.f32 %v405_v53, %v343_v56  ;;  %v420_v45 = vadd.f32 %v408_v54, %v346_v51  ;;  %v436_v61 = vpop.permute.xlu0 %435  ;;  %v1623_v18 = vpop.permute.xlu1 %739  ;;  %v467_v56 = vld [vmem:[#allocation2 + $0xc0] sm:$0xff]  ;;  %v262_v54 = vld [vmem:[#allocation2 + $0x1b0] sm:$0xff] }
 0x1a7   :  { %v457_v52 = vsel %vm453_vm5, %v436_v61, %v1502_v6  ;;  %v460_v59 = vsel %vm453_vm5, %v1488_v2, %v436_v61 }
 0x1a8   :  { %v480_v62 = vmul.f32 %v468_v32, %v460_v59  ;;  %v481_v3 = vmul.f32 %v469_v60, %v457_v52  ;;  %747 = vrot.lane.b32.xlu0 %v1546_v20, %s1209_s7  ;;  %809 = vrot.lane.b32.xlu1 %v1535_v15, %s1202_s1 }
 0x1aa   :  { %v492_v12 = vadd.f32 %v480_v62, %v418_v36  ;;  %v493_v16 = vadd.f32 %v481_v3, %v419_v37  ;;  %v448_v30 = vpop.permute.xlu0 %447  ;;  %v1635_v48 = vpop.permute.xlu1 %288  ;;  %v543_v37 = vld [vmem:[#allocation2 + $0x130] sm:$0xff] }
 0x1ab   :  { %v454_v31 = vsel %vm453_vm5, %v1502_v6, %v448_v30  ;;  %v463_v34 = vsel %vm453_vm5, %v448_v30, %v1488_v2  ;;  %v311_v36 = vsel %vm306_vm2, %v1635_v48, %v1504_v7  ;;  %v542_v6 = vld [vmem:[#allocation2 + $0x128] sm:$0xff]  ;;  %v876_v2 = vld [vmem:[%s2010_s4 + $0x18] sm:$0xf] }
 0x1ac   :  { %v479_v44 = vmul.f32 %v467_v56, %v463_v34  ;;  %v482_v49 = vmul.f32 %v470_v29, %v454_v31  ;;  %815 = vrot.lane.b32.xlu0 %v1482_v1, %s1202_s1  ;;  %821 = vrot.lane.b32.xlu1 %v1546_v20, %s1202_s1  ;;  %v337_v61 = vmul.f32 %v325_v50, %v311_v36  ;;  %v326_v56 = vld [vmem:[#allocation2 + $0x38] sm:$0xff]  ;;  %v541_v29 = vld [vmem:[#allocation2 + $0x120] sm:$0xff]  ;;  %v399_v31 = vld [vmem:[#allocation2 + $0x90] sm:$0xff] }
 0x1ad   :  { %v544_v30 = vld [vmem:[#allocation2 + $0x138] sm:$0xff] }
 0x1ae   :  { %v491_v51 = vadd.f32 %v479_v44, %v417_v55  ;;  %v494_v53 = vadd.f32 %v482_v49, %v420_v45  ;;  %v510_v32 = vpop.permute.xlu0 %509  ;;  %v1655_v60 = vpop.permute.xlu1 %300  ;;  %v274_v55 = vmul.f32 %v262_v54, %v1321_v33 }
 0x1af   :  { %v531_v52 = vsel %vm527_vm6, %v510_v32, %v1518_v10  ;;  %v534_v59 = vsel %vm527_vm6, %v1510_v8, %v510_v32  ;;  %v308_v45 = vsel %vm306_vm2, %v1504_v7, %v1655_v60  ;;  %v615_v32 = vld [vmem:[#allocation2 + $0x1e0] sm:$0xff] }
 0x1b0   :  { %v554_v62 = vmul.f32 %v542_v6, %v534_v59  ;;  %v555_v3 = vmul.f32 %v543_v37, %v531_v52  ;;  %931 = vperm.xlu0 %1143, %v876_v2   ;;  %v349_v36 = vadd.f32 %v337_v61, %v274_v55  ;;  %v263_v6 = vld [vmem:[#allocation2 + $0x1b8] sm:$0xff]  ;;  %v616_v61 = vld [vmem:[#allocation2 + $0x1e8] sm:$0xff] }
 0x1b1   :  { %v400_v52 = vld [vmem:[#allocation2 + $0x98] sm:$0xff]  ;;  %v275_v59 = vmul.f32 %v263_v6, %v1387_v39 }
 0x1b2   :  { %v566_v34 = vadd.f32 %v554_v62, %v492_v12  ;;  %v567_v44 = vadd.f32 %v555_v3, %v493_v16  ;;  %v522_v49 = vpop.permute.xlu0 %521  ;;  %v1668_v50 = vpop.permute.xlu1 %363  ;;  %v338_v16 = vmul.f32 %v326_v56, %v308_v45 }
 0x1b3   :  { %v528_v33 = vsel %vm527_vm6, %v1518_v10, %v522_v49  ;;  %v537_v7 = vsel %vm527_vm6, %v522_v49, %v1510_v8  ;;  %v384_v12 = vsel %vm379_vm4, %v1668_v50, %v1520_v11  ;;  %v473_v49 = vld [vmem:[#allocation2 + $0xf0] sm:$0xff] }
 0x1b4   :  { %v553_v37 = vmul.f32 %v541_v29, %v537_v7  ;;  %v556_v2 = vmul.f32 %v544_v30, %v528_v33  ;;  %v411_v54 = vmul.f32 %v399_v31, %v384_v12  ;;  %v350_v39 = vadd.f32 %v338_v16, %v275_v59  ;;  %v617_v30 = vld [vmem:[#allocation2 + $0x1f0] sm:$0xff]  ;;  %v618_v31 = vld [vmem:[#allocation2 + $0x1f8] sm:$0xff] }
 0x1b6   :  { %v565_v62 = vadd.f32 %v553_v37, %v491_v51  ;;  %v568_v10 = vadd.f32 %v556_v2, %v494_v53  ;;  %v423_v3 = vadd.f32 %v411_v54, %v349_v36  ;;  %v584_v55 = vpop.permute.xlu0 %583  ;;  %v1682_v42 = vpop.permute.xlu1 %375 }
 0x1b7   :  { %v605_v8 = vsel %vm601_vm7, %v584_v55, %v1538_v17  ;;  %v608_v56 = vsel %vm601_vm7, %v1527_v13, %v584_v55  ;;  %v381_v45 = vsel %vm379_vm4, %v1520_v11, %v1682_v42 }
 0x1b8   :  { %v627_v51 = vmul.f32 %v615_v32, %v608_v56  ;;  %v628_v53 = vmul.f32 %v616_v61, %v605_v8  ;;  %v412_v29 = vmul.f32 %v400_v52, %v381_v45  ;;  %v689_v32 = vld [vmem:[#allocation2 + $0x240] sm:$0xff]  ;;  %v690_v61 = vld [vmem:[#allocation2 + $0x248] sm:$0xff]  ;;  %v474_v52 = vld [vmem:[#allocation2 + $0xf8] sm:$0xff] }
 0x1ba   :  { %v639_v36 = vadd.f32 %v627_v51, %v565_v62  ;;  %v640_v6 = vadd.f32 %v628_v53, %v566_v34  ;;  %v424_v33 = vadd.f32 %v412_v29, %v350_v39  ;;  %v596_v7 = vpop.permute.xlu0 %595  ;;  %v1694_v12 = vpop.permute.xlu1 %437  ;;  %v692_v51 = vld [vmem:[#allocation2 + $0x258] sm:$0xff]  ;;  %v547_v53 = vld [vmem:[#allocation2 + $0x150] sm:$0xff] }
 0x1bb   :  { %v602_v37 = vsel %vm601_vm7, %v1538_v17, %v596_v7  ;;  %v611_v11 = vsel %vm601_vm7, %v596_v7, %v1527_v13  ;;  %v458_v16 = vsel %vm453_vm5, %v1694_v12, %v1540_v19 }
 0x1bc   :  { %v629_v2 = vmul.f32 %v617_v30, %v602_v37  ;;  %v630_v54 = vmul.f32 %v618_v31, %v611_v11  ;;  %v485_v34 = vmul.f32 %v473_v49, %v458_v16 }
 0x1be   :  { %v641_v59 = vadd.f32 %v629_v2, %v567_v44  ;;  %v642_v62 = vadd.f32 %v630_v54, %v568_v10  ;;  %v497_v17 = vadd.f32 %v485_v34, %v423_v3  ;;  %v658_v55 = vpop.permute.xlu0 %657  ;;  %v1707_v8 = vpop.permute.xlu1 %449  ;;  %v691_v3 = vld [vmem:[#allocation2 + $0x250] sm:$0xff]  ;;  %v764_v2 = vld [vmem:[#allocation2 + $0x2a8] sm:$0xff]  ;;  %v548_v54 = vld [vmem:[#allocation2 + $0x158] sm:$0xff] }
 0x1bf   :  { %v679_v13 = vsel %vm675_vm8, %v658_v55, %v1556_v23  ;;  %v682_v56 = vsel %vm675_vm8, %v1548_v21, %v658_v55  ;;  %v455_v45 = vsel %vm453_vm5, %v1540_v19, %v1707_v8  ;;  %v837_v34 = vld [vmem:[#allocation2 + $0x300] sm:$0xff]  ;;  %v838_v55 = vld [vmem:[#allocation2 + $0x308] sm:$0xff] }
 0x1c0   :  { %v701_v39 = vmul.f32 %v689_v32, %v682_v56  ;;  %v702_v44 = vmul.f32 %v690_v61, %v679_v13  ;;  %v486_v10 = vmul.f32 %v474_v52, %v455_v45 }
 0x1c2   :  { %v713_v29 = vadd.f32 %v701_v39, %v639_v36  ;;  %v714_v30 = vadd.f32 %v702_v44, %v640_v6  ;;  %v498_v31 = vadd.f32 %v486_v10, %v424_v33  ;;  %v670_v49 = vpop.permute.xlu0 %669  ;;  %v1719_v7 = vpop.permute.xlu1 %511  ;;  %v763_v33 = vld [vmem:[#allocation2 + $0x2a0] sm:$0xff]  ;;  %v849_v39 = vmul.f32 %v837_v34, %v1480_v0  ;;  %v765_v44 = vld [vmem:[#allocation2 + $0x2b0] sm:$0xff]  ;;  %v766_v10 = vld [vmem:[#allocation2 + $0x2b8] sm:$0xff] }
 0x1c3   :  { %v676_v37 = vsel %vm675_vm8, %v1556_v23, %v670_v49  ;;  %v685_v19 = vsel %vm675_vm8, %v670_v49, %v1548_v21  ;;  %v532_v11 = vsel %vm527_vm6, %v1719_v7, %v1558_v24  ;;  %v323_v34 = vld [vmem:[#allocation2 + $0x20] sm:$0xff] }
 0x1c4   :  { %v703_v16 = vmul.f32 %v691_v3, %v676_v37  ;;  %v704_v36 = vmul.f32 %v692_v51, %v685_v19  ;;  %v559_v6 = vmul.f32 %v547_v53, %v532_v11  ;;  %v850_v3 = vmul.f32 %v838_v55, %v1476_v63  ;;  %v839_v51 = vld [vmem:[#allocation2 + $0x310] sm:$0xff] }
 0x1c5   :  { %v390_v55 = vsel %vm379_vm4, %v1682_v42, %v1512_v9 }
 0x1c6   :  { %v715_v32 = vadd.f32 %v703_v16, %v641_v59  ;;  %v716_v23 = vadd.f32 %v704_v36, %v642_v62  ;;  %v1732_v61 = vadd.f32 %v559_v6, %v497_v17  ;;  %v732_v52 = vpop.permute.xlu0 %731  ;;  %v1734_v21 = vpop.permute.xlu1 %523  ;;  %v260_v16 = vld [vmem:[#allocation2 + $0x1a0] sm:$0xff]  ;;  %v261_v36 = vld [vmem:[#allocation2 + $0x1a8] sm:$0xff]  ;;  %v840_v6 = vld [vmem:[#allocation2 + $0x318] sm:$0xff] }
 0x1c7   :  { %v753_v13 = vsel %vm749_vm9, %v732_v52, %v1572_v27  ;;  %v756_v56 = vsel %vm749_vm9, %v1564_v25, %v732_v52  ;;  %v529_v59 = vsel %vm527_vm6, %v1558_v24, %v1734_v21  ;;  %v273_v52 = vmul.f32 %v261_v36, %v1381_v38 }
 0x1c8   :  { %v775_v62 = vmul.f32 %v763_v33, %v756_v56  ;;  %v776_v17 = vmul.f32 %v764_v2, %v753_v13  ;;  %v560_v45 = vmul.f32 %v548_v54, %v529_v59  ;;  %v398_v2 = vld [vmem:[#allocation2 + $0x88] sm:$0xff]  ;;  %v387_v54 = vsel %vm379_vm4, %v1512_v9, %v1668_v50  ;;  %v397_v50 = vld [vmem:[#allocation2 + $0x80] sm:$0xff] }
 0x1c9   :  { %v324_v56 = vld [vmem:[#allocation2 + $0x28] sm:$0xff]  ;;  %v410_v9 = vmul.f32 %v398_v2, %v387_v54 }
 0x1ca   :  { %v787_v53 = vadd.f32 %v775_v62, %v713_v29  ;;  %v788_v49 = vadd.f32 %v776_v17, %v714_v30  ;;  %v572_v37 = vadd.f32 %v560_v45, %v498_v31  ;;  %v744_v19 = vpop.permute.xlu0 %743  ;;  %v1748_v11 = vpop.permute.xlu1 %585  ;;  %v851_v31 = vmul.f32 %v839_v51, %v1492_v4  ;;  %v621_v62 = vld [vmem:[#allocation2 + $0x210] sm:$0xff]  ;;  %v622_v17 = vld [vmem:[#allocation2 + $0x218] sm:$0xff] }
 0x1cb   :  { %v750_v24 = vsel %vm749_vm9, %v1572_v27, %v744_v19  ;;  %v759_v0 = vsel %vm749_vm9, %v744_v19, %v1564_v25  ;;  %v272_v27 = vmul.f32 %v260_v16, %v1327_v35  ;;  %v852_v25 = vmul.f32 %v840_v6, %v1496_v5 }
 0x1cc   :  { %v1756_v33 = vadd.f32 %v849_v39, %v787_v53  ;;  %v1758_v63 = vadd.f32 %v850_v3, %v788_v49  ;;  %v777_v29 = vmul.f32 %v765_v44, %v750_v24  ;;  %v778_v30 = vmul.f32 %v766_v10, %v759_v0  ;;  %v471_v44 = vld [vmem:[#allocation2 + $0xe0] sm:$0xff]  ;;  %v472_v53 = vld [vmem:[#allocation2 + $0xe8] sm:$0xff] }
 0x1cd   :  { %v409_v51 = vmul.f32 %v397_v50, %v390_v55  ;;  %v461_v49 = vsel %vm453_vm5, %v1529_v14, %v1694_v12  ;;  %v535_v19 = vsel %vm527_vm6, %v1550_v22, %v1719_v7  ;;  %v545_v24 = vld [vmem:[#allocation2 + $0x140] sm:$0xff]  ;;  %v538_v0 = vsel %vm527_vm6, %v1734_v21, %v1550_v22 }
 0x1ce   :  { %v789_v13 = vadd.f32 %v777_v29, %v715_v32  ;;  %v790_v4 = vadd.f32 %v778_v30, %v716_v23  ;;  %v283_v59 = vpop.permute.xlu0 %282  ;;  %v598_v45 = vpop.permute.xlu1 %597  ;;  %v484_v2 = vmul.f32 %v472_v53, %v461_v49  ;;  %v619_v7 = vld [vmem:[#allocation2 + $0x200] sm:$0xff]  ;;  %v609_v54 = vsel %vm601_vm7, %v1566_v26, %v1748_v11  ;;  %v842_v53 = vld [vmem:[#allocation2 + $0x328] sm:$0xff] }
 0x1cf   :  { %v314_v35 = vsel %vm306_vm2, %v283_v59, %v1635_v48  ;;  %v317_v38 = vsel %vm306_vm2, %v1655_v60, %v283_v59  ;;  %v603_v42 = vsel %vm601_vm7, %v1574_v28, %v598_v45  ;;  %v612_v5 = vsel %vm601_vm7, %v598_v45, %v1566_v26 }
 0x1d0   :  { %v1784_v32 = vadd.f32 %v851_v31, %v789_v13  ;;  %v1786_v23 = vadd.f32 %v852_v25, %v790_v4  ;;  %v335_v39 = vmul.f32 %v323_v34, %v317_v38  ;;  %v464_v48 = vsel %vm453_vm5, %v1707_v8, %v1529_v14  ;;  %v546_v8 = vld [vmem:[#allocation2 + $0x148] sm:$0xff]  ;;  %v693_v4 = vld [vmem:[#allocation2 + $0x260] sm:$0xff]  ;;  %v695_v38 = vld [vmem:[#allocation2 + $0x270] sm:$0xff] }
 0x1d1   :  { %v336_v60 = vmul.f32 %v324_v56, %v314_v35  ;;  %v633_v10 = vmul.f32 %v621_v62, %v603_v42  ;;  %v634_v3 = vmul.f32 %v622_v17, %v612_v5  ;;  %v483_v12 = vmul.f32 %v471_v44, %v464_v48  ;;  %v620_v13 = vld [vmem:[#allocation2 + $0x208] sm:$0xff] }
 0x1d2   :  { %v347_v16 = vadd.f32 %v335_v39, %v272_v27  ;;  %v1800_v36 = vpop.permute.xlu0 %801  ;;  %v660_v6 = vpop.permute.xlu1 %659  ;;  %v696_v27 = vld [vmem:[#allocation2 + $0x278] sm:$0xff]  ;;  %v558_v25 = vmul.f32 %v546_v8, %v535_v19  ;;  %v557_v55 = vmul.f32 %v545_v24, %v538_v0  ;;  %v606_v22 = vsel %vm601_vm7, %v1748_v11, %v1574_v28  ;;  %v694_v56 = vld [vmem:[#allocation2 + $0x268] sm:$0xff] }
 0x1d3   :  { %v348_v29 = vadd.f32 %v336_v60, %v273_v52  ;;  %v1807_v30 = vadd.f32 %v633_v10, %v1732_v61  ;;  %v646_v14 = vadd.f32 %v634_v3, %v572_v37  ;;  %v680_v26 = vsel %vm675_vm8, %v660_v6, %v1596_v57  ;;  %v768_v60 = vld [vmem:[#allocation2 + $0x2c8] sm:$0xff] }
 0x1d4   :  { %v421_v31 = vadd.f32 %v409_v51, %v347_v16  ;;  %v683_v59 = vsel %vm675_vm8, %v1580_v43, %v660_v6  ;;  %v631_v17 = vmul.f32 %v619_v7, %v609_v54  ;;  %v1828_v45 = vadd.f32 %v1427_v41, %v1756_v33  ;;  %v841_v51 = vld [vmem:[#allocation2 + $0x320] sm:$0xff]  ;;  %v769_v7 = vld [vmem:[#allocation2 + $0x2d0] sm:$0xff]  ;;  %v770_v54 = vld [vmem:[#allocation2 + $0x2d8] sm:$0xff] }
 0x1d5   :  { %v422_v34 = vadd.f32 %v410_v9, %v348_v29  ;;  %v632_v50 = vmul.f32 %v620_v13, %v606_v22  ;;  %v705_v9 = vmul.f32 %v693_v4, %v683_v59  ;;  %v706_v39 = vmul.f32 %v694_v56, %v680_v26  ;;  %v844_v13 = vld [vmem:[#allocation2 + $0x338] sm:$0xff] }
 0x1d6   :  { %v495_v61 = vadd.f32 %v483_v12, %v421_v31  ;;  %v814_v21 = vpop.permute.xlu0 %813  ;;  %v672_v37 = vpop.permute.xlu1 %671  ;;  %v893_v8 = vadd.f32 %v1427_v41, %v1758_v63 }
 0x1d7   :  { %v496_v52 = vadd.f32 %v484_v2, %v422_v34  ;;  %v686_v62 = vsel %vm675_vm8, %v672_v37, %v1580_v43  ;;  %v677_v42 = vsel %vm675_vm8, %v1596_v57, %v672_v37  ;;  %v767_v43 = vld [vmem:[#allocation2 + $0x2c0] sm:$0xff] }
 0x1d8   :  { %v569_v28 = vadd.f32 %v557_v55, %v495_v61  ;;  %v708_v11 = vmul.f32 %v696_v27, %v686_v62  ;;  %v707_v16 = vmul.f32 %v695_v38, %v677_v42  ;;  %v843_v55 = vld [vmem:[#allocation2 + $0x330] sm:$0xff]  ;;  %v905_v4 = vmax.f32 %v893_v8, 0.0 }
 0x1d9   :  { %v570_v35 = vadd.f32 %v558_v25, %v496_v52 }
 0x1da   :  { %v643_v5 = vadd.f32 %v631_v17, %v569_v28  ;;  %v720_v44 = vadd.f32 %v708_v11, %v646_v14  ;;  %v808_v48 = vpop.permute.xlu0 %807  ;;  %v734_v10 = vpop.permute.xlu1 %733  ;;  %v904_v14 = vmax.f32 %v1828_v45, 0.0  ;;  %v719_v61 = vadd.f32 %v707_v16, %v1807_v30 }
 0x1db   :  { %v644_v3 = vadd.f32 %v632_v50, %v570_v35  ;;  %v828_v33 = vsel %vm823_vm3, %v808_v48, %v814_v21  ;;  %v831_v49 = vsel %vm823_vm3, %v1800_v36, %v808_v48  ;;  %v754_v57 = vsel %vm749_vm9, %v734_v10, %v1623_v18 }
 0x1dc   :  { %v717_v19 = vadd.f32 %v705_v9, %v643_v5  ;;  %v757_v6 = vsel %vm749_vm9, %v1610_v47, %v734_v10  ;;  %v780_v29 = vmul.f32 %v768_v60, %v754_v57  ;;  %v853_v12 = vmul.f32 %v841_v51, %v831_v49 }
 0x1dd   :  { %v718_v24 = vadd.f32 %v706_v39, %v644_v3  ;;  %v779_v0 = vmul.f32 %v767_v43, %v757_v6  ;;  %v854_v31 = vmul.f32 %v842_v53, %v828_v33  ;;  %v917_v48 = vmin.f32 %v905_v4, 6.0 }
 0x1de   :  { %v820_v2 = vpop.permute.xlu0 %819  ;;  %v746_v34 = vpop.permute.xlu1 %745  ;;  %v916_v43 = vmin.f32 %v904_v14, 6.0 }
 0x1df   :  { %v791_v27 = vadd.f32 %v779_v0, %v717_v19  ;;  %v792_v25 = vadd.f32 %v780_v29, %v718_v24  ;;  %v825_v22 = vsel %vm823_vm3, %v814_v21, %v820_v2  ;;  %v834_v63 = vsel %vm823_vm3, %v820_v2, %v1800_v36 }
 0x1e0   :  { %v751_v37 = vsel %vm749_vm9, %v1623_v18, %v746_v34  ;;  %v760_v52 = vsel %vm749_vm9, %v746_v34, %v1610_v47  ;;  %v894_v21 = vadd.f32 %v1427_v41, %v1784_v32  ;;  %v855_v17 = vmul.f32 %v843_v55, %v825_v22 }
 0x1e1   :  { %v865_v56 = vadd.f32 %v853_v12, %v791_v27  ;;  %v866_v26 = vadd.f32 %v854_v31, %v792_v25  ;;  %v781_v59 = vmul.f32 %v769_v7, %v751_v37  ;;  %v782_v62 = vmul.f32 %v770_v54, %v760_v52  ;;  %v329_v37 = vld [vmem:[#allocation2 + $0x50] sm:$0xff] }
 0x1e2   :  { %v856_v36 = vmul.f32 %v844_v13, %v834_v63  ;;  %v1861_v28 = vpop.permute.xlu1 %581  ;;  %v285_v30 = vpop.permute.xlu0 %284  ;;  %v895_v18 = vadd.f32 %v1427_v41, %v1786_v23  ;;  %v906_v9 = vmax.f32 %v894_v21, 0.0  ;;  %v265_v63 = vld [vmem:[#allocation2 + $0x1c8] sm:$0xff] }
 0x1e3   :  { %v896_v11 = vadd.f32 %v1417_v40, %v865_v56  ;;  %v793_v45 = vadd.f32 %v781_v59, %v719_v61  ;;  %v794_v47 = vadd.f32 %v782_v62, %v720_v44  ;;  %v897_v50 = vadd.f32 %v1417_v40, %v866_v26  ;;  %v328_v61 = vld [vmem:[#allocation2 + $0x48] sm:$0xff]  ;;  %v266_v56 = vld [vmem:[#allocation2 + $0x1d0] sm:$0xff]  ;;  %v327_v26 = vld [vmem:[#allocation2 + $0x40] sm:$0xff] }
 0x1e4   :  { %v907_v60 = vmax.f32 %v895_v18, 0.0  ;;  %v918_v6 = vmin.f32 %v906_v9, 6.0  ;;  %v330_v59 = vld [vmem:[#allocation2 + $0x58] sm:$0xff] }
 0x1e5   :  { %v908_v35 = vmax.f32 %v896_v11, 0.0  ;;  %v867_v38 = vadd.f32 %v855_v17, %v793_v45  ;;  %v868_v42 = vadd.f32 %v856_v36, %v794_v47  ;;  %v909_v5 = vmax.f32 %v897_v50, 0.0  ;;  %v402_v17 = vld [vmem:[#allocation2 + $0xa8] sm:$0xff]  ;;  %v403_v36 = vld [vmem:[#allocation2 + $0xb0] sm:$0xff]  ;;  %v264_v50 = vld [vmem:[#allocation2 + $0x1c0] sm:$0xff] }
 0x1e6   :  { %v1867_v32 = vpop.permute.xlu1 %593  ;;  %v297_v39 = vpop.permute.xlu0 %296  ;;  %v919_v19 = vmin.f32 %v907_v60, 6.0  ;;  %v267_v9 = vld [vmem:[#allocation2 + $0x1d8] sm:$0xff]  ;;  %v476_v60 = vld [vmem:[#allocation2 + $0x108] sm:$0xff] }
 0x1e7   :  { %v898_v10 = vadd.f32 %v1417_v40, %v867_v38  ;;  %v921_v41 = vmin.f32 %v909_v5, 6.0  ;;  %v920_v23 = vmin.f32 %v908_v35, 6.0  ;;  %v899_v3 = vadd.f32 %v1417_v40, %v868_v42 }
 0x1e8   :  { %v278_v42 = vmul.f32 %v266_v56, %v1482_v1  ;;  %v277_v5 = vmul.f32 %v265_v63, %v1535_v15  ;;  %v279_v15 = vmul.f32 %v267_v9, %v1546_v20 }
 0x1e9   :  { %v910_v44 = vmax.f32 %v898_v10, 0.0  ;;  %v1121_v51 = vpack.c.bf16 %v921_v41, %v917_v48  ;;  %v1123_v53 = vpack.c.bf16 %v920_v23, %v916_v43  ;;  %v911_v33 = vmax.f32 %v899_v3, 0.0  ;;  %v477_v10 = vld [vmem:[#allocation2 + $0x110] sm:$0xff] }
 0x1ea   :  { %v1871_v49 = vpop.permute.xlu1 %655  ;;  %v360_v57 = vpop.permute.xlu0 %359  ;;  %v276_v3 = vmul.f32 %v264_v50, %v1463_v58 }
 0x1eb   :  { %1122 = vmatprep.subr.bf16.mxu0 %v1121_v51  ;;  %v923_v16 = vmin.f32 %v911_v33, 6.0  ;;  %v922_v8 = vmin.f32 %v910_v44, 6.0  ;;  %v401_v51 = vld [vmem:[#allocation2 + $0xa0] sm:$0xff] }
 0x1ec   :  { %1124 = vmatpush1.bf16.msra.mxu0 %v1123_v53 }
 0x1ed   :  { %v1125_v24 = vpack.c.bf16 %v923_v16, %v919_v19  ;;  %v1127_v0 = vpack.c.bf16 %v922_v8, %v918_v6  ;;  %v404_v16 = vld [vmem:[#allocation2 + $0xb8] sm:$0xff] }
 0x1ee   :  { %v1873_v29 = vpop.permute.xlu1 %667  ;;  %v372_v14 = vpop.permute.xlu0 %371 }
 0x1ef   :  { %1126 = vmatprep.subr.bf16.mxu1 %v1125_v24 }
 0x1f0   :  { %1128 = vmatpush1.bf16.msra.mxu1 %v1127_v0 }
 0x1f2   :  { %v1875_v40 = vpop.permute.xlu1 %729  ;;  %v1877_v12 = vpop.permute.xlu0 %433 }
 0x1f6   :  { %v1879_v31 = vpop.permute.xlu1 %741  ;;  %v446_v2 = vpop.permute.xlu0 %445 }
 0x1fa   :  { %v1881_v7 = vpop.permute.xlu0 %507  ;;  %v291_v54 = vpop.permute.xlu1 %290 }
 0x1fb   :  { %v312_v52 = vsel %vm306_vm2, %v291_v54, %v297_v39  ;;  %v315_v4 = vsel %vm306_vm2, %v285_v30, %v291_v54 }
 0x1fc   :  { %v340_v45 = vmul.f32 %v328_v61, %v315_v4  ;;  %v341_v47 = vmul.f32 %v329_v37, %v312_v52  ;;  %v478_v61 = vld [vmem:[#allocation2 + $0x118] sm:$0xff]  ;;  %v551_v37 = vld [vmem:[#allocation2 + $0x170] sm:$0xff]  ;;  %v623_v52 = vld [vmem:[#allocation2 + $0x220] sm:$0xff] }
 0x1fd   :  { %v624_v4 = vld [vmem:[#allocation2 + $0x228] sm:$0xff] }
 0x1fe   :  { %v1883_v34 = vpop.permute.xlu0 %519  ;;  %v303_v27 = vpop.permute.xlu1 %302  ;;  %v352_v44 = vadd.f32 %v340_v45, %v277_v5  ;;  %v353_v1 = vadd.f32 %v341_v47, %v278_v42  ;;  %v698_v42 = vld [vmem:[#allocation2 + $0x288] sm:$0xff] }
 0x1ff   :  { %v309_v62 = vsel %vm306_vm2, %v297_v39, %v303_v27  ;;  %v318_v21 = vsel %vm306_vm2, %v303_v27, %v285_v30 }
 0x200   :  { %v339_v39 = vmul.f32 %v327_v26, %v318_v21  ;;  %v342_v30 = vmul.f32 %v330_v59, %v309_v62 }
 0x202   :  { %v1885_v25 = vpop.permute.xlu0 %803  ;;  %v366_v55 = vpop.permute.xlu1 %365  ;;  %v351_v0 = vadd.f32 %v339_v39, %v276_v3  ;;  %v354_v54 = vadd.f32 %v342_v30, %v279_v15  ;;  %v697_v15 = vld [vmem:[#allocation2 + $0x280] sm:$0xff] }
 0x203   :  { %v385_v18 = vsel %vm379_vm4, %v366_v55, %v372_v14  ;;  %v388_v11 = vsel %vm379_vm4, %v360_v57, %v366_v55  ;;  %v475_v55 = vld [vmem:[#allocation2 + $0x100] sm:$0xff] }
 0x204   :  { %v414_v48 = vmul.f32 %v402_v17, %v388_v11  ;;  %v415_v43 = vmul.f32 %v403_v36, %v385_v18  ;;  %v626_v11 = vld [vmem:[#allocation2 + $0x238] sm:$0xff] }
 0x206   :  { %v588_v13 = vpop.permute.xlu0 %587  ;;  %v378_v22 = vpop.permute.xlu1 %377  ;;  %v426_v27 = vadd.f32 %v414_v48, %v352_v44  ;;  %v427_v58 = vadd.f32 %v415_v43, %v353_v1 }
 0x207   :  { %v391_v53 = vsel %vm379_vm4, %v378_v22, %v360_v57  ;;  %v382_v6 = vsel %vm379_vm4, %v372_v14, %v378_v22  ;;  %v607_v20 = vsel %vm601_vm7, %v588_v13, %v1867_v32  ;;  %v550_v22 = vld [vmem:[#allocation2 + $0x168] sm:$0xff]  ;;  %v610_v56 = vsel %vm601_vm7, %v1861_v28, %v588_v13 }
 0x208   :  { %v413_v63 = vmul.f32 %v401_v51, %v391_v53  ;;  %v416_v26 = vmul.f32 %v404_v16, %v382_v6  ;;  %v699_v6 = vld [vmem:[#allocation2 + $0x290] sm:$0xff] }
 0x20a   :  { %v600_v35 = vpop.permute.xlu0 %599  ;;  %v440_v38 = vpop.permute.xlu1 %439  ;;  %v428_v9 = vadd.f32 %v416_v26, %v354_v54  ;;  %v773_v54 = vld [vmem:[#allocation2 + $0x2f0] sm:$0xff] }
 0x20b   :  { %v459_v41 = vsel %vm453_vm5, %v440_v38, %v446_v2  ;;  %v462_v23 = vsel %vm453_vm5, %v1877_v12, %v440_v38  ;;  %v604_v59 = vsel %vm601_vm7, %v1867_v32, %v600_v35  ;;  %v635_v38 = vmul.f32 %v623_v52, %v610_v56 }
 0x20c   :  { %v488_v8 = vmul.f32 %v476_v60, %v462_v23  ;;  %v489_v24 = vmul.f32 %v477_v10, %v459_v41  ;;  %v549_v60 = vld [vmem:[#allocation2 + $0x160] sm:$0xff]  ;;  %v552_v10 = vld [vmem:[#allocation2 + $0x178] sm:$0xff] }
 0x20e   :  { %v662_v33 = vpop.permute.xlu0 %661  ;;  %v452_v19 = vpop.permute.xlu1 %451  ;;  %v500_v17 = vadd.f32 %v488_v8, %v426_v27  ;;  %v501_v36 = vadd.f32 %v489_v24, %v427_v58  ;;  %v772_v24 = vld [vmem:[#allocation2 + $0x2e8] sm:$0xff]  ;;  %v700_v27 = vld [vmem:[#allocation2 + $0x298] sm:$0xff] }
 0x20f   :  { %v456_v57 = vsel %vm453_vm5, %v446_v2, %v452_v19  ;;  %v465_v14 = vsel %vm453_vm5, %v452_v19, %v1877_v12  ;;  %v613_v2 = vsel %vm601_vm7, %v600_v35, %v1861_v28  ;;  %v625_v12 = vld [vmem:[#allocation2 + $0x230] sm:$0xff]  ;;  %v636_v28 = vmul.f32 %v624_v4, %v607_v20 }
 0x210   :  { %v487_v45 = vmul.f32 %v475_v55, %v465_v14  ;;  %v490_v32 = vmul.f32 %v478_v61, %v456_v57  ;;  %v425_v35 = vadd.f32 %v413_v63, %v351_v0  ;;  %v681_v5 = vsel %vm675_vm8, %v662_v33, %v1873_v29  ;;  %v771_v55 = vld [vmem:[#allocation2 + $0x2e0] sm:$0xff] }
 0x211   :  { %v637_v39 = vmul.f32 %v625_v12, %v604_v59  ;;  %v638_v23 = vmul.f32 %v626_v11, %v613_v2  ;;  %v684_v3 = vsel %vm675_vm8, %v1871_v49, %v662_v33  ;;  %v710_v51 = vmul.f32 %v698_v42, %v681_v5  ;;  %v846_v12 = vld [vmem:[#allocation2 + $0x348] sm:$0xff]  ;;  %v845_v11 = vld [vmem:[#allocation2 + $0x340] sm:$0xff] }
 0x212   :  { %v674_v62 = vpop.permute.xlu0 %673  ;;  %v514_v21 = vpop.permute.xlu1 %513  ;;  %v499_v53 = vadd.f32 %v487_v45, %v425_v35  ;;  %v502_v19 = vadd.f32 %v490_v32, %v428_v9  ;;  %v709_v52 = vmul.f32 %v697_v15, %v684_v3  ;;  %v2014_v3 = vld [vmem:[#allocation8_spill] sm:$0xff] }
 0x213   :  { %v533_v18 = vsel %vm527_vm6, %v514_v21, %v1883_v34  ;;  %v536_v13 = vsel %vm527_vm6, %v1881_v7, %v514_v21  ;;  %v678_v8 = vsel %vm675_vm8, %v1873_v29, %v674_v62 }
 0x214   :  { %v562_v47 = vmul.f32 %v550_v22, %v536_v13  ;;  %v563_v50 = vmul.f32 %v551_v37, %v533_v18  ;;  %v774_v22 = vld [vmem:[#allocation2 + $0x2f8] sm:$0xff]  ;;  %v711_v4 = vmul.f32 %v699_v6, %v678_v8 }
 0x216   :  { %v574_v30 = vadd.f32 %v562_v47, %v500_v17  ;;  %v575_v48 = vadd.f32 %v563_v50, %v501_v36  ;;  %v736_v43 = vpop.permute.xlu0 %735  ;;  %v526_v41 = vpop.permute.xlu1 %525  ;;  %v847_v17 = vld [vmem:[#allocation2 + $0x350] sm:$0xff] }
 0x217   :  { %v530_v44 = vsel %vm527_vm6, %v1883_v34, %v526_v41  ;;  %v539_v1 = vsel %vm527_vm6, %v526_v41, %v1881_v7  ;;  %v755_v33 = vsel %vm749_vm9, %v736_v43, %v1879_v31  ;;  %v687_v7 = vsel %vm675_vm8, %v674_v62, %v1871_v49 }
 0x218   :  { %v648_v16 = vadd.f32 %v636_v28, %v574_v30  ;;  %v561_v34 = vmul.f32 %v549_v60, %v539_v1  ;;  %v564_v0 = vmul.f32 %v552_v10, %v530_v44  ;;  %v649_v58 = vadd.f32 %v637_v39, %v575_v48 }
 0x219   :  { %v758_v29 = vsel %vm749_vm9, %v1875_v40, %v736_v43  ;;  %v784_v56 = vmul.f32 %v772_v24, %v755_v33  ;;  %v712_v59 = vmul.f32 %v700_v27, %v687_v7  ;;  %v928_v33 = vld [vmem:[%s2009_s3] sm:$0xf] }
 0x21a   :  { %v722_v20 = vadd.f32 %v710_v51, %v648_v16  ;;  %v748_v63 = vpop.permute.xlu0 %747  ;;  %v810_v61 = vpop.permute.xlu1 %809  ;;  %v573_v57 = vadd.f32 %v561_v34, %v499_v53  ;;  %v576_v14 = vadd.f32 %v564_v0, %v502_v19  ;;  %v783_v2 = vmul.f32 %v771_v55, %v758_v29  ;;  %v1145_v29 = vld [vmem:[%s2006_s0] sm:$0x1f] }
 0x21b   :  { %v752_v37 = vsel %vm749_vm9, %v1879_v31, %v748_v63  ;;  %v761_v49 = vsel %vm749_vm9, %v748_v63, %v1875_v40  ;;  %v723_v18 = vadd.f32 %v711_v4, %v649_v58  ;;  %v832_v31 = vsel %vm823_vm3, %v1885_v25, %v810_v61  ;;  %v848_v40 = vld [vmem:[#allocation2 + $0x358] sm:$0xff] }
 0x21c   :  { %v785_v26 = vmul.f32 %v773_v54, %v752_v37  ;;  %v647_v62 = vadd.f32 %v635_v38, %v573_v57  ;;  %v650_v21 = vadd.f32 %v638_v23, %v576_v14  ;;  %v796_v36 = vadd.f32 %v784_v56, %v722_v20  ;;  %v1146_v57 = vld [vmem:[%s2006_s0 + $0x10] sm:$0x1f] }
 0x21d   :  { %v786_v13 = vmul.f32 %v774_v22, %v761_v49  ;;  %v857_v48 = vmul.f32 %v845_v11, %v832_v31  ;;  %v1147_v22 = vld [vmem:[%s2006_s0 + $0x8] sm:$0x1f]  ;;  %v1148_v49 = vld [vmem:[%s2006_s0 + $0x18] sm:$0x1f] }
 0x21e   :  { %v816_v45 = vpop.permute.xlu0 %815  ;;  %v822_v32 = vpop.permute.xlu1 %821  ;;  %v724_v47 = vadd.f32 %v712_v59, %v650_v21  ;;  %v721_v50 = vadd.f32 %v709_v52, %v647_v62  ;;  %v797_v35 = vadd.f32 %v785_v26, %v723_v18 }
 0x21f   :  { %v829_v28 = vsel %vm823_vm3, %v810_v61, %v816_v45  ;;  %v826_v38 = vsel %vm823_vm3, %v816_v45, %v822_v32  ;;  %v835_v5 = vsel %vm823_vm3, %v822_v32, %v1885_v25 }
 0x220   :  { %v858_v42 = vmul.f32 %v846_v12, %v829_v28  ;;  %v859_v9 = vmul.f32 %v847_v17, %v826_v38  ;;  %v798_v39 = vadd.f32 %v786_v13, %v724_v47  ;;  %v795_v30 = vadd.f32 %v783_v2, %v721_v50 }
 0x221   :  { %v860_v43 = vmul.f32 %v848_v40, %v835_v5 }
 0x222   :  { %v870_v60 = vadd.f32 %v858_v42, %v796_v36  ;;  %v871_v10 = vadd.f32 %v859_v9, %v797_v35  ;;  %v869_v41 = vadd.f32 %v857_v48, %v795_v30 }
 0x223   :  { %v872_v23 = vadd.f32 %v860_v43, %v798_v39 }
 0x224   :  { %v902_v44 = vadd.f32 %v2014_v3, %v871_v10  ;;  %v901_v1 = vadd.f32 %v2014_v3, %v870_v60  ;;  %v900_v15 = vadd.f32 %v2014_v3, %v869_v41 }
 0x225   :  { %v903_v51 = vadd.f32 %v2014_v3, %v872_v23 }
 0x226   :  { %v914_v53 = vmax.f32 %v902_v44, 0.0  ;;  %v913_v46 = vmax.f32 %v901_v1, 0.0  ;;  %v912_v25 = vmax.f32 %v900_v15, 0.0 }
 0x227   :  { %v915_v19 = vmax.f32 %v903_v51, 0.0 }
 0x228   :  { %v925_v16 = vmin.f32 %v913_v46, 6.0  ;;  %v926_v6 = vmin.f32 %v914_v53, 6.0  ;;  %v924_v24 = vmin.f32 %v912_v25, 6.0 }
 0x229   :  { %v927_v8 = vmin.f32 %v915_v19, 6.0 }
 0x22a   :  { %942 = vmatprep.subr.mxu0 %v925_v16 }
 0x22b   :  { %1013 = vmatprep.subr.mxu1 %v927_v8  ;;  %943 = vmatpush1.msra.mxu0 %v924_v24 }
 0x22c   :  { %1014 = vmatpush1.msra.mxu1 %v926_v6  ;;  %1119 = vmatmul.mubr.msk.f32.vlgmr.msra.gmra.mrb[6].mxu0 %vm934_vm10, %v928_v33 }
 0x22d   :  { %1120 = vmatmul.mubr.msk.f32.vlgmr.msra.gmra.mrb[6].mxu1 %vm934_vm10, %v928_v33 }
 0x22f   :  { %v932_v34 = vpop.permute.xlu0 %931 }
 0x2ff   :  { %v1004_v0 = vpop.f32.mrb[6].mxu0 }
 0x300   :  { %v1005_v54 = vadd.f32 %v1004_v0, %v932_v34  ;;  %v1075_v27 = vpop.f32.mrb[6].mxu1  ;;  %v1006_v7 = vpop.f32.mrb[7].mxu0 }
 0x301   :  { %v1076_v58 = vadd.f32 %v1075_v27, %v932_v34  ;;  %v1007_v55 = vadd.f32 %v1006_v7, %v932_v34  ;;  %v1077_v20 = vpop.f32.mrb[7].mxu1 }
 0x302   :  { %v1080_v63 = vadd.f32 %v1145_v29, %v1005_v54  ;;  %v1078_v61 = vadd.f32 %v1077_v20, %v932_v34 }
 0x303   :  { %v1082_v14 = vadd.f32 %v1146_v57, %v1076_v58  ;;  %v1081_v37 = vadd.f32 %v1147_v22, %v1007_v55 }
 0x304   :  { %v1083_v52 = vadd.f32 %v1148_v49, %v1078_v61 }
 0x305   :  { %v1088_v4 = vcombine.low %v1080_v63, %v1081_v37 }
 0x306   :  { %v1089_v56 = vcombine.low %v1082_v14, %v1083_v52 }
 0x307   :  { %1092 = vst [vmem:[#allocation5] sm:$0xff] %v1088_v4 }
 0x308   :  { %1093 = vst [vmem:[#allocation5 + $0x8] sm:$0xff] %v1089_v56 }
 0x309   :  { %1182 = shalt.err (!%p1179_p12)
}
 0x30a   :  { %s1183_s22 = scalar_lea.hbm %s2011_s5, 256 }
 0x30b   :  { %p1184_p13 = scmp.ne.s32.totalorder %s2011_s5, %s1183_s22  ;;  %p1187_p0 = scmp.lt.u32.totalorder %s1183_s22, %s2011_s5 }
 0x30d   :  { %p1189_p1 = pnand %p1187_p0, %p1184_p13 }
 0x30f   :  { %1192 = shalt.err (!%p1189_p1)
}
 0x310   :  { %1103 = dma.vmem_to_hbm [thread:$0]  %s1101_s16, 256, %s2011_s5, [#allocation4]  }
 0x311   :  { %1195 = dma.done.wait [#allocation4], 256  }
 0x312   :  { %1196 = vsyncadd [#allocation4], 4294967040 }
 0x313   :  { %1107 = vsyncpa [#allocation3], 1 }
 0x314   :  { %1108 = vsyncpa [#allocation4], 1 }

</bundles_post_ra>
